<compile_context>
chip_gen: v6e
topology: v6e:2x2x1
jax: 0.10.0
libtpu: 0.0.40
codegen_flags: <defaults>
</compile_context>

<pallas_src>
import functools

import jax
import jax.numpy as jnp
from jax.experimental import pallas as pl
from jax.experimental.pallas import tpu as pltpu


_LANE = 128      # TPU lane width: output / weight N dimension is padded to this
_ROW_ALIGN = 64  # row-tile granularity (covers f32/bf16/int8 sublane tilings)


def _round_up(x, m):
    return ((x + m - 1) // m) * m


def _vmem_limit_bytes():
    """Conservative, generation-aware VMEM limit for the pallas_call."""
    try:
        cap = int(pltpu.get_tpu_info().vmem_capacity_bytes)
    except Exception:
        cap = 64 * 1024 * 1024  # v7x per-TC VMEM, the smallest of v5e/v6e/v7x
    return min(cap // 2, 64 * 1024 * 1024)


def _choose_row_tile(m_rows, k_dim, cout_p, in_itemsize):
    """Pick the row tile: as large as the VMEM budget allows (double-buffered
    patches + f32 output tiles plus resident weights), capped at 2048 rows, and
    small enough that the grid has >= 2 steps (v7x has 2 TensorCores)."""
    budget = int(0.6 * _vmem_limit_bytes())
    resident = k_dim * cout_p * in_itemsize + 4 * cout_p          # W_eff + bias
    per_row = 2 * k_dim * in_itemsize + 2 * cout_p * 4            # dbl-buffered in + out
    tm = (budget - resident) // max(per_row, 1)
    tm = min(tm, 2048)
    tm = min(tm, _round_up(max(1, -(-m_rows // 2)), _ROW_ALIGN))  # >= 2 grid steps
    tm = min(tm, _round_up(m_rows, _ROW_ALIGN))                   # don't exceed problem
    return max(_ROW_ALIGN, (tm // _ROW_ALIGN) * _ROW_ALIGN)


# ----------------------------------------------------------------------------
# Pallas kernel: single fused matmul (patches @ W_eff) + bias, lane-dense output
# ----------------------------------------------------------------------------
def _lcnn_kernel(p_ref, w_ref, b_ref, o_ref):
    # p_ref : (tm, K)        bf16/f32 im2col rows for this tile
    # w_ref : (K, Cout_pad)  folded dictionary @ lookup weights (resident)
    # b_ref : (1, Cout_pad)  f32 bias row (lane-dense, resident)
    # o_ref : (tm, Cout_pad) f32 output tile (lane-dense, unmasked stores)
    acc = jnp.dot(p_ref[...], w_ref[...], preferred_element_type=jnp.float32)
    o_ref[...] = (acc + b_ref[...]).astype(o_ref.dtype)


def _lcnn_matmul(patches, w_eff_p, bias_p):
    m_pad, k_dim = patches.shape
    cout_p = w_eff_p.shape[1]
    tm = patches.shape[0] // max(1, patches.shape[0] // _choose_row_tile(
        m_pad, k_dim, cout_p, jnp.dtype(patches.dtype).itemsize))
    # (m_pad is already a multiple of the chosen tile; recompute defensively)
    tm = _choose_row_tile(m_pad, k_dim, cout_p, jnp.dtype(patches.dtype).itemsize)
    assert m_pad % tm == 0
    grid = (m_pad // tm,)

    return pl.pallas_call(
        _lcnn_kernel,
        out_shape=jax.ShapeDtypeStruct((m_pad, cout_p), jnp.float32),
        grid_spec=pltpu.PrefetchScalarGridSpec(
            num_scalar_prefetch=0,
            grid=grid,
            in_specs=[
                pl.BlockSpec((tm, k_dim), lambda i: (i, 0)),
                pl.BlockSpec((k_dim, cout_p), lambda i: (0, 0)),
                pl.BlockSpec((1, cout_p), lambda i: (0, 0)),
            ],
            out_specs=pl.BlockSpec((tm, cout_p), lambda i: (i, 0)),
        ),
        compiler_params=pltpu.CompilerParams(
            dimension_semantics=("parallel",),
            vmem_limit_bytes=_vmem_limit_bytes()),
    )(patches, w_eff_p, bias_p)


# ----------------------------------------------------------------------------
# Offline weight prep: sparsity (top-k) + fold dictionary/lookup into W_eff
# ----------------------------------------------------------------------------
def kaiming_uniform(key, shape, fan_in):
    # matches torch.nn.init.kaiming_uniform_(a=0, mode='fan_in'): bound = sqrt(6/fan_in)
    bound = jnp.sqrt(6.0 / fan_in)
    return jax.random.uniform(key, shape, jnp.float32, -bound, bound)


def enforce_sparsity(lookup_weights, sparsity):
    # Keep the top (1 - sparsity) fraction of entries by |value|, zero the rest.
    # (Tie-breaking on equal magnitudes may differ from torch.sort; values identical.)
    flat = lookup_weights.reshape(-1)
    num_keep = int(flat.size * (1.0 - sparsity))
    if num_keep <= 0:
        return jnp.zeros_like(lookup_weights)
    if num_keep >= flat.size:
        return lookup_weights
    _, idx = jax.lax.top_k(jnp.abs(flat), num_keep)
    mask = jnp.zeros((flat.size,), dtype=bool).at[idx].set(True)
    return jnp.where(mask, flat, 0.0).reshape(lookup_weights.shape)


def fold_lcnn_weights(dictionary, lookup_weights, bias, *, sparsity,
                      compute_dtype=jnp.bfloat16):
    """Run once (not per forward): sparsify lookup weights and fold them with the
    dictionary into a single (K, Cout_pad) matrix + lane-dense bias row."""
    d_size, cin, kh, kw = dictionary.shape
    cout = lookup_weights.shape[0]
    k_dim = cin * kh * kw

    lw_sparse = enforce_sparsity(lookup_weights, sparsity)            # (Cout, D)
    # Column ordering: (ki, kj)-major, channel-minor -- must match extract_patches().
    dict_flat = dictionary.transpose(0, 2, 3, 1).reshape(d_size, k_dim)
    w_eff = dict_flat.T @ lw_sparse.T                                 # (K, Cout) f32

    cout_p = _round_up(cout, _LANE)
    w_eff_p = jnp.zeros((k_dim, cout_p), jnp.float32).at[:, :cout].set(w_eff)
    w_eff_p = w_eff_p.astype(compute_dtype)
    bias_p = jnp.zeros((1, cout_p), jnp.float32).at[0, :cout].set(
        bias.astype(jnp.float32))
    return w_eff_p, bias_p


# ----------------------------------------------------------------------------
# Forward pass
# ----------------------------------------------------------------------------
def extract_patches(x, kernel_size, stride, padding, compute_dtype):
    """im2col in one fused XLA pass on the bf16 NHWC-padded input.
    Columns ordered (ki, kj)-major, channel-minor to match fold_lcnn_weights."""
    b, cin, h, w = x.shape
    kh, kw = kernel_size
    sh, sw = stride
    ph, pw = padding
    ho = (h + 2 * ph - kh) // sh + 1
    wo = (w + 2 * pw - kw) // sw + 1

    xp = x.astype(compute_dtype)
    xp = jnp.pad(xp, ((0, 0), (0, 0), (ph, ph), (pw, pw)))
    xp = xp.transpose(0, 2, 3, 1)                       # NHWC (transpose of the *small* input)
    cols = []
    for ki in range(kh):
        for kj in range(kw):
            cols.append(xp[:, ki:ki + sh * (ho - 1) + 1:sh,
                           kj:kj + sw * (wo - 1) + 1:sw, :])
    patches = jnp.concatenate(cols, axis=-1)            # (B, Ho, Wo, kh*kw*Cin)
    return patches.reshape(b * ho * wo, kh * kw * cin), ho, wo


def lcnn_conv2d_forward(x, w_eff_p, bias_p, *, out_channels, kernel_size,
                        stride, padding):
    b = x.shape[0]
    k_dim, cout_p = w_eff_p.shape
    compute_dtype = w_eff_p.dtype

    patches, ho, wo = extract_patches(x, kernel_size, stride, padding, compute_dtype)
    m_rows = patches.shape[0]

    tm = _choose_row_tile(m_rows, k_dim, cout_p, jnp.dtype(compute_dtype).itemsize)
    m_pad = _round_up(m_rows, tm)
    if m_pad != m_rows:
        patches = jnp.pad(patches, ((0, m_pad - m_rows), (0, 0)))

    out_mat = _lcnn_matmul(patches, w_eff_p, bias_p)     # (M_pad, Cout_pad) f32

    out = out_mat[:m_rows, :out_channels].reshape(b, ho, wo, out_channels)
    return out.transpose(0, 3, 1, 2)                     # NCHW, matching the module


# ----------------------------------------------------------------------------
# Pure-JAX reference mirroring the PyTorch module (conv2d -> lookup mm -> bias)
# ----------------------------------------------------------------------------
def lcnn_conv2d_reference(x, dictionary, lookup_weights, bias, *,
                          stride, padding, sparsity):
    d_size, cin, kh, kw = dictionary.shape
    cout = lookup_weights.shape[0]
    ph, pw = padding
    lw_sparse = enforce_sparsity(lookup_weights, sparsity)
    feat = jax.lax.conv_general_dilated(
        x, dictionary, window_strides=stride, padding=[(ph, ph), (pw, pw)],
        dimension_numbers=("NCHW", "OIHW", "NCHW"))                   # (B, D, Ho, Wo)
    b, _, ho, wo = feat.shape
    inter = feat.reshape(b, d_size, ho * wo).transpose(0, 2, 1)       # (B, Ho*Wo, D)
    out = jnp.einsum("bpd,od->bpo", inter, lw_sparse)                 # (B, Ho*Wo, Cout)
    out = out.reshape(b, ho, wo, cout).transpose(0, 3, 1, 2)          # NCHW
    return out + bias.reshape(1, cout, 1, 1)


if __name__ == "__main__":
    # Small, TPU-friendly shapes consistent with the module.
    B, Cin, H, W = 2, 4, 16, 16
    Cout = 8
    kernel_size = (3, 3)
    stride = (1, 1)
    padding = (1, 1)
    dictionary_size = 64
    sparsity = 0.5

    key = jax.random.PRNGKey(0)
    k_x, k_dict, k_lw, k_b = jax.random.split(key, 4)

    x = jax.random.normal(k_x, (B, Cin, H, W), jnp.float32)
    dictionary = kaiming_uniform(
        k_dict, (dictionary_size, Cin, *kernel_size),
        fan_in=Cin * kernel_size[0] * kernel_size[1])
    lookup_weights = kaiming_uniform(
        k_lw, (Cout, dictionary_size), fan_in=dictionary_size)
    # Module inits bias to zeros; use a nonzero bias here so the bias path is exercised.
    bias = 0.1 * jax.random.normal(k_b, (Cout,), jnp.float32)

    ref = lcnn_conv2d_reference(x, dictionary, lookup_weights, bias,
                                stride=stride, padding=padding, sparsity=sparsity)

    fwd = jax.jit(functools.partial(
        lcnn_conv2d_forward, out_channels=Cout, kernel_size=kernel_size,
        stride=stride, padding=padding))

    # Default fast path: bf16 operands, f32 accumulation.
    w_bf16, bias_p = fold_lcnn_weights(dictionary, lookup_weights, bias,
                                       sparsity=sparsity,
                                       compute_dtype=jnp.bfloat16)
    out = jax.block_until_ready(fwd(x, w_bf16, bias_p))
    assert out.shape == (B, Cout, H, W), out.shape
    assert jnp.allclose(out, ref, rtol=5e-2, atol=5e-2), \
        float(jnp.max(jnp.abs(out - ref)))

    # f32 path: tight semantic check against the conv-based module reference.
    w_f32, bias_p32 = fold_lcnn_weights(dictionary, lookup_weights, bias,
                                        sparsity=sparsity,
                                        compute_dtype=jnp.float32)
    out32 = jax.block_until_ready(fwd(x, w_f32, bias_p32))
    assert jnp.allclose(out32, ref, rtol=1e-3, atol=1e-3), \
        float(jnp.max(jnp.abs(out32 - ref)))

    print("KERNEL_OK")
</pallas_src>

<mosaic_0001>
module attributes {stable_mosaic.version = 11 : i64} {
  func.func @_lcnn_kernel(%arg0: i32, %arg1: memref<256x36xbf16, #tpu.memory_space<vmem>>, %arg2: memref<36x128xbf16, #tpu.memory_space<vmem>>, %arg3: memref<1x128xf32, #tpu.memory_space<vmem>>, %arg4: memref<256x128xf32, #tpu.memory_space<vmem>>) attributes {dimension_semantics = [#tpu.dimension_semantics<parallel>], iteration_bounds = array<i64: 2>, scalar_prefetch = 0 : i64, scratch_operands = 0 : i64, tpu.core_type = #tpu.core_type<tc>, window_params = [{transform_indices = @transform_0, window_bounds = array<i64: 256, 36>}, {pipeline_mode = #tpu.pipeline_mode<synchronous>, transform_indices = @transform_1, window_bounds = array<i64: 36, 128>}, {pipeline_mode = #tpu.pipeline_mode<synchronous>, transform_indices = @transform_2, window_bounds = array<i64: 1, 128>}, {transform_indices = @transform_3, window_bounds = array<i64: 256, 128>}]} {
    %c0 = arith.constant 0 : index
    %c0_0 = arith.constant 0 : index
    %0 = vector.load %arg1[%c0, %c0_0] : memref<256x36xbf16, #tpu.memory_space<vmem>>, vector<256x36xbf16>
    %c0_1 = arith.constant 0 : index
    %c0_2 = arith.constant 0 : index
    %1 = vector.load %arg2[%c0_1, %c0_2] : memref<36x128xbf16, #tpu.memory_space<vmem>>, vector<36x128xbf16>
    %cst = arith.constant dense<0.000000e+00> : vector<256x128xf32>
    %2 = tpu.matmul %0, %1, %cst {dimension_numbers = #tpu.dot_dimension_numbers<[1], [0], [0], [1], [0, 0, 1, 1], [], []>} : vector<256x36xbf16>, vector<36x128xbf16>, vector<256x128xf32> -> vector<256x128xf32>
    %c0_3 = arith.constant 0 : index
    %c0_4 = arith.constant 0 : index
    %3 = vector.load %arg3[%c0_3, %c0_4] : memref<1x128xf32, #tpu.memory_space<vmem>>, vector<1x128xf32>
    %4 = vector.broadcast %3 : vector<1x128xf32> to vector<256x128xf32>
    %5 = arith.addf %2, %4 : vector<256x128xf32>
    %c0_5 = arith.constant 0 : index
    %c0_6 = arith.constant 0 : index
    %6 = vector.load %arg4[%c0_5, %c0_6] : memref<256x128xf32, #tpu.memory_space<vmem>>, vector<256x128xf32>
    tpu.vector_store %arg4[%c0_5, %c0_6], %5 {strides = array<i32>} : memref<256x128xf32, #tpu.memory_space<vmem>>, vector<256x128xf32>,
    return
  }
  func.func @transform_0(%arg0: i32) -> (i32, i32) {
    %c0_i32 = arith.constant 0 : i32
    %c0_i32_0 = arith.constant 0 : i32
    return %arg0, %c0_i32 : i32, i32
  }
  func.func @transform_1(%arg0: i32) -> (i32, i32) {
    %c0_i32 = arith.constant 0 : i32
    %c0_i32_0 = arith.constant 0 : i32
    %c0_i32_1 = arith.constant 0 : i32
    return %c0_i32, %c0_i32_0 : i32, i32
  }
  func.func @transform_2(%arg0: i32) -> (i32, i32) {
    %c0_i32 = arith.constant 0 : i32
    %c0_i32_0 = arith.constant 0 : i32
    %c0_i32_1 = arith.constant 0 : i32
    return %c0_i32, %c0_i32_0 : i32, i32
  }
  func.func @transform_3(%arg0: i32) -> (i32, i32) {
    %c0_i32 = arith.constant 0 : i32
    %c0_i32_0 = arith.constant 0 : i32
    return %arg0, %c0_i32 : i32, i32
  }
}

</mosaic_0001>

<bundles_post_ra>
// kernel: lcnn_conv2d_forward.1
= control target key start
LH: loop header
LB: loop body
LE: loop exit
PB: predicated region body
PF: predicated region fallthrough
CT: control target
= control target key end

     0   :  { %s783_s12 = smov 0   ;;  %s918_s0 = inlined_call_operand.vmem [shape: bf16[512,36], index: 0, kind: input, shape index: {}]   ;;  %s919_s1 = inlined_call_operand.vmem [shape: bf16[36,128], index: 1, kind: input, shape index: {}]   ;;  %s920_s2 = inlined_call_operand.vmem [shape: f32[1,128], index: 2, kind: input, shape index: {}]   ;;  %s921_s3 = inlined_call_operand.vmem [shape: f32[512,128], index: 3, kind: output, shape index: {}]  }
   0x1 LB: > { %s616_s13 = sadd.s32 4294967295, %s761_s12   ;;  %p620_p0 = scmp.ge.s32.totalorder %s761_s12, 1  ;;  %s761_s12 = sphi %s783_s12, %s13_s12  }
   0x2   : > { %p138_p1 = scmp.lt.s32.totalorder %s761_s12, 3 }
   0x4   : > { %p139_p2 = pnand %p620_p0, %p138_p1 }
   0x5   : > { %s621_s18 = sshll.u32 (!%p139_p2), %s616_s13, 5 }
   0x6   : > { %142 = sbr.rel (%p139_p2) target bundleno = 250 (0xfa), region = 32  ;;  %p163_p3 = scmp.lt.s32.totalorder (!%p139_p2), %s621_s18, 63 }
   0xb   : > { %v736_v0 = vld [vmem:[%s919_s1 + $0x10] ss:$0 sps:$4 sm:$0x33]   ;;  %vm363_vm0 = vcmask 1041408   ;;  %v737_v1 = vld [vmem:[%s919_s1 + $0x8] sm:$0xff]   ;;  %v738_v3 = vld [vmem:[%s919_s1] sm:$0xff]  }
   0xc   : > { %726 = vmatprep.subr.msk.bf16.mxu0 %vm363_vm0, %v736_v0  ;;  %727 = vmatprep.subr.msk.bf16.mxu1 %vm363_vm0, %v736_v0  ;;  %v365_v2 = vsel %vm363_vm0, %v736_v0, 0  ;;  %s923_s18 = smov (!%p163_p3, %s621_s18), 63  ;;  %vm314_vm1 = vcmask 293888   ;;  %v844_v20 = vld [vmem:[%s920_s2] ss:$0 sm:$0xff] }
   0xd   : > { %683 = vmatpush3.bf16.msra.mxu0 %v365_v2  ;;  %723 = vmatpush3.bf16.msra.mxu1 %v365_v2  ;;  %s622_s21 = sshll.u32 %s923_s18, 2  ;;  %s624_s25 = sshll.u32 %s923_s18, 3 }
   0xe   : > { %684 = vmatprep.subr.bf16.mxu0 %v737_v1  ;;  %721 = vmatprep.subr.bf16.mxu1 %v737_v1  ;;  %s806_s24 = scalar_lea.vmem %s918_s0, %s622_s21  ;;  %s849_s30 = scalar_lea.vmem %s921_s3, %s624_s25 }
   0xf   : > { %v739_v4 = vld [vmem:[%s806_s24] sm:$0xff]   ;;  %v741_v6 = vld [vmem:[%s806_s24 + $0x8] sm:$0xff]   ;;  %v743_v8 = vld [vmem:[%s806_s24 + $0x10] sm:$0xff]  }
  0x10   : > { %v740_v5 = vld [vmem:[%s806_s24 + $0x40] sm:$0xff]   ;;  %688 = vmatprep.mubr.msk.bf16.mxu0 %vm314_vm1, %v739_v4  ;;  %v742_v7 = vld [vmem:[%s806_s24 + $0x48] sm:$0xff]   ;;  %v744_v9 = vld [vmem:[%s806_s24 + $0x50] sm:$0xff]  }
  0x11   : > { %685 = vmatpush3.bf16.msra.mxu0 %v737_v1  ;;  %724 = vmatpush3.bf16.msra.mxu1 %v737_v1  ;;  %v745_v10 = vld [vmem:[%s806_s24 + $0x18] sm:$0xff]   ;;  %v747_v12 = vld [vmem:[%s806_s24 + $0x20] sm:$0xff]   ;;  %v749_v14 = vld [vmem:[%s806_s24 + $0x28] sm:$0xff]  }
  0x12   : > { %686 = vmatprep.subr.bf16.mxu0 %v738_v3  ;;  %722 = vmatprep.subr.bf16.mxu1 %v738_v3  ;;  %v746_v11 = vld [vmem:[%s806_s24 + $0x58] sm:$0xff]   ;;  %v748_v13 = vld [vmem:[%s806_s24 + $0x60] sm:$0xff]   ;;  %v750_v15 = vld [vmem:[%s806_s24 + $0x68] sm:$0xff]  }
  0x13   : > { %704 = vmatprep.mubr.msk.bf16.mxu1 %vm314_vm1, %v740_v5  ;;  %v751_v16 = vld [vmem:[%s806_s24 + $0x30] sm:$0xff]   ;;  %v753_v18 = vld [vmem:[%s806_s24 + $0x38] sm:$0xff]  }
  0x14   : > { %v752_v17 = vld [vmem:[%s806_s24 + $0x70] sm:$0xff]   ;;  %v754_v19 = vld [vmem:[%s806_s24 + $0x78] sm:$0xff]  }
  0x15   : > { %687 = vmatpush3.bf16.msra.mxu0 %v738_v3  ;;  %725 = vmatpush3.bf16.msra.mxu1 %v738_v3 }
  0x18   : > { %689 = vmatmul.mubr.msk.bf16.vlgmr.msra.gmra.mxu0 %vm314_vm1, %v741_v6  ;;  %705 = vmatmul.mubr.msk.bf16.vlgmr.msra.gmra.mxu1 %vm314_vm1, %v742_v7 }
  0x19   : > { %692 = vmatprep.mubr.msk.bf16.mxu0 %vm314_vm1, %v743_v8  ;;  %708 = vmatprep.mubr.msk.bf16.mxu1 %vm314_vm1, %v744_v9 }
  0x20   : > { %693 = vmatmul.mubr.msk.bf16.gmra.mxu0 %vm314_vm1, %v745_v10  ;;  %709 = vmatmul.mubr.msk.bf16.gmra.mxu1 %vm314_vm1, %v746_v11 }
  0x21   : > { %696 = vmatprep.mubr.msk.bf16.mxu0 %vm314_vm1, %v747_v12  ;;  %712 = vmatprep.mubr.msk.bf16.mxu1 %vm314_vm1, %v748_v13 }
  0x28   : > { %697 = vmatmul.mubr.msk.bf16.gmra.mxu0 %vm314_vm1, %v749_v14  ;;  %713 = vmatmul.mubr.msk.bf16.gmra.mxu1 %vm314_vm1, %v750_v15 }
  0x29   : > { %700 = vmatprep.mubr.msk.bf16.mxu0 %vm314_vm1, %v751_v16  ;;  %716 = vmatprep.mubr.msk.bf16.mxu1 %vm314_vm1, %v752_v17 }
  0x30   : > { %701 = vmatmul.mubr.msk.bf16.gmra.mxu0 %vm314_vm1, %v753_v18  ;;  %717 = vmatmul.mubr.msk.bf16.gmra.mxu1 %vm314_vm1, %v754_v19 }
  0xd8   : > { %v690_v21 = vpop.f32.mrf.mxu0  ;;  %v706_v22 = vpop.f32.mrf.mxu1 }
  0xd9   : > { %v410_v23 = vadd.f32 %v690_v21, %v844_v20  ;;  %v474_v24 = vadd.f32 %v706_v22, %v844_v20 }
  0xda   : > { %v401_v25 = vpop.f32.mrf.mxu0  ;;  %v465_v26 = vpop.f32.mrf.mxu1 }
  0xdb   : > { %530 = vst [vmem:[%s849_s30 + $0x10] sm:$0xff] %v410_v23  ;;  %546 = vst [vmem:[%s849_s30 + $0x90] sm:$0xff] %v474_v24  ;;  %v402_v27 = vadd.f32 %v844_v20, %v401_v25  ;;  %v466_v28 = vadd.f32 %v844_v20, %v465_v26 }
  0xdc   : > { %v691_v29 = vpop.f32.mrf.mxu0  ;;  %v707_v30 = vpop.f32.mrf.mxu1 }
  0xdd   : > { %528 = vst [vmem:[%s849_s30] sm:$0xff] %v402_v27  ;;  %544 = vst [vmem:[%s849_s30 + $0x80] sm:$0xff] %v466_v28  ;;  %v413_v31 = vadd.f32 %v691_v29, %v844_v20  ;;  %v477_v32 = vadd.f32 %v707_v30, %v844_v20 }
  0xde   : > { %v404_v33 = vpop.f32.mrf.mxu0  ;;  %v468_v34 = vpop.f32.mrf.mxu1 }
  0xdf   : > { %531 = vst [vmem:[%s849_s30 + $0x18] sm:$0xff] %v413_v31  ;;  %547 = vst [vmem:[%s849_s30 + $0x98] sm:$0xff] %v477_v32  ;;  %v405_v35 = vadd.f32 %v844_v20, %v404_v33  ;;  %v469_v36 = vadd.f32 %v844_v20, %v468_v34 }
  0xe0   : > { %v694_v37 = vpop.f32.mrf.mxu0  ;;  %v710_v38 = vpop.f32.mrf.mxu1 }
  0xe1   : > { %529 = vst [vmem:[%s849_s30 + $0x8] sm:$0xff] %v405_v35  ;;  %545 = vst [vmem:[%s849_s30 + $0x88] sm:$0xff] %v469_v36  ;;  %v426_v39 = vadd.f32 %v694_v37, %v844_v20  ;;  %v490_v40 = vadd.f32 %v710_v38, %v844_v20 }
  0xe2   : > { %v417_v41 = vpop.f32.mrf.mxu0  ;;  %v481_v42 = vpop.f32.mrf.mxu1 }
  0xe3   : > { %534 = vst [vmem:[%s849_s30 + $0x30] sm:$0xff] %v426_v39  ;;  %550 = vst [vmem:[%s849_s30 + $0xb0] sm:$0xff] %v490_v40  ;;  %v418_v43 = vadd.f32 %v844_v20, %v417_v41  ;;  %v482_v44 = vadd.f32 %v844_v20, %v481_v42 }
  0xe4   : > { %v695_v45 = vpop.f32.mrf.mxu0  ;;  %v711_v46 = vpop.f32.mrf.mxu1 }
  0xe5   : > { %532 = vst [vmem:[%s849_s30 + $0x20] sm:$0xff] %v418_v43  ;;  %548 = vst [vmem:[%s849_s30 + $0xa0] sm:$0xff] %v482_v44  ;;  %v429_v47 = vadd.f32 %v695_v45, %v844_v20  ;;  %v493_v48 = vadd.f32 %v711_v46, %v844_v20 }
  0xe6   : > { %v420_v49 = vpop.f32.mrf.mxu0  ;;  %v484_v50 = vpop.f32.mrf.mxu1 }
  0xe7   : > { %535 = vst [vmem:[%s849_s30 + $0x38] sm:$0xff] %v429_v47  ;;  %551 = vst [vmem:[%s849_s30 + $0xb8] sm:$0xff] %v493_v48  ;;  %v421_v51 = vadd.f32 %v844_v20, %v420_v49  ;;  %v485_v52 = vadd.f32 %v844_v20, %v484_v50 }
  0xe8   : > { %v698_v53 = vpop.f32.mrf.mxu0  ;;  %v714_v54 = vpop.f32.mrf.mxu1 }
  0xe9   : > { %533 = vst [vmem:[%s849_s30 + $0x28] sm:$0xff] %v421_v51  ;;  %549 = vst [vmem:[%s849_s30 + $0xa8] sm:$0xff] %v485_v52  ;;  %v442_v55 = vadd.f32 %v698_v53, %v844_v20  ;;  %v506_v56 = vadd.f32 %v714_v54, %v844_v20 }
  0xea   : > { %v433_v57 = vpop.f32.mrf.mxu0  ;;  %v497_v58 = vpop.f32.mrf.mxu1 }
  0xeb   : > { %538 = vst [vmem:[%s849_s30 + $0x50] sm:$0xff] %v442_v55  ;;  %554 = vst [vmem:[%s849_s30 + $0xd0] sm:$0xff] %v506_v56  ;;  %v434_v59 = vadd.f32 %v844_v20, %v433_v57  ;;  %v498_v60 = vadd.f32 %v844_v20, %v497_v58 }
  0xec   : > { %v699_v61 = vpop.f32.mrf.mxu0  ;;  %v715_v62 = vpop.f32.mrf.mxu1 }
  0xed   : > { %536 = vst [vmem:[%s849_s30 + $0x40] sm:$0xff] %v434_v59  ;;  %552 = vst [vmem:[%s849_s30 + $0xc0] sm:$0xff] %v498_v60  ;;  %v445_v63 = vadd.f32 %v699_v61, %v844_v20  ;;  %v509_v0 = vadd.f32 %v715_v62, %v844_v20 }
  0xee   : > { %v436_v1 = vpop.f32.mrf.mxu0  ;;  %v500_v2 = vpop.f32.mrf.mxu1 }
  0xef   : > { %539 = vst [vmem:[%s849_s30 + $0x58] sm:$0xff] %v445_v63  ;;  %555 = vst [vmem:[%s849_s30 + $0xd8] sm:$0xff] %v509_v0  ;;  %v437_v3 = vadd.f32 %v844_v20, %v436_v1  ;;  %v501_v4 = vadd.f32 %v844_v20, %v500_v2 }
  0xf0   : > { %v702_v5 = vpop.f32.mrf.mxu0  ;;  %v718_v6 = vpop.f32.mrf.mxu1 }
  0xf1   : > { %537 = vst [vmem:[%s849_s30 + $0x48] sm:$0xff] %v437_v3  ;;  %553 = vst [vmem:[%s849_s30 + $0xc8] sm:$0xff] %v501_v4  ;;  %v458_v7 = vadd.f32 %v702_v5, %v844_v20  ;;  %v522_v8 = vadd.f32 %v718_v6, %v844_v20 }
  0xf2   : > { %v449_v9 = vpop.f32.mrf.mxu0  ;;  %v513_v10 = vpop.f32.mrf.mxu1 }
  0xf3   : > { %542 = vst [vmem:[%s849_s30 + $0x70] sm:$0xff] %v458_v7  ;;  %558 = vst [vmem:[%s849_s30 + $0xf0] sm:$0xff] %v522_v8  ;;  %v450_v11 = vadd.f32 %v844_v20, %v449_v9  ;;  %v514_v12 = vadd.f32 %v844_v20, %v513_v10 }
  0xf4   : > { %v703_v13 = vpop.f32.mrf.mxu0  ;;  %v719_v14 = vpop.f32.mrf.mxu1 }
  0xf5   : > { %540 = vst [vmem:[%s849_s30 + $0x60] sm:$0xff] %v450_v11  ;;  %556 = vst [vmem:[%s849_s30 + $0xe0] sm:$0xff] %v514_v12  ;;  %v461_v15 = vadd.f32 %v703_v13, %v844_v20  ;;  %v525_v16 = vadd.f32 %v719_v14, %v844_v20 }
  0xf6   : > { %v452_v17 = vpop.f32.mrf.mxu0  ;;  %v516_v18 = vpop.f32.mrf.mxu1 }
  0xf7   : > { %543 = vst [vmem:[%s849_s30 + $0x78] sm:$0xff] %v461_v15  ;;  %559 = vst [vmem:[%s849_s30 + $0xf8] sm:$0xff] %v525_v16  ;;  %v453_v19 = vadd.f32 %v844_v20, %v452_v17  ;;  %v517_v21 = vadd.f32 %v844_v20, %v516_v18 }
  0xf9   : > { %541 = vst [vmem:[%s849_s30 + $0x68] sm:$0xff] %v453_v19  ;;  %557 = vst [vmem:[%s849_s30 + $0xe8] sm:$0xff] %v517_v21 }
  0xfa PF: > { %s13_s12 = sadd.s32 1, %s761_s12  }
  0xfb   : > { %p10_p4 = scmp.ge.s32.totalorder %s13_s12, 4  }
  0xfd   :  { %12 = sbr.rel (!%p10_p4) target bundleno = 1 (0x1), region = 62 }

</bundles_post_ra>
